<compile_context>
chip_gen: v7x
topology: tpu7x:2x2x1
jax: 0.10.0
libtpu: 0.0.40
codegen_flags: <defaults>
</compile_context>

<pallas_src>
import numpy as np
import jax
import jax.numpy as jnp
from jax.experimental import pallas as pl
from jax.experimental.pallas import tpu as pltpu

LOG2 = float(np.log(2.0))
OUT_PAD = 128        # lane-dense padded width for the 3-wide head output
MAX_TILE = 4096      # node-tile cap (per-step footprint still only ~0.5 MiB at bf16)


def _round_up(n, m):
    return ((n + m - 1) // m) * m


def _cdiv(a, b):
    return -(-a // b)


def _ssp(v):
    """ShiftedSoftplus: softplus(x) - log(2)."""
    return jax.nn.softplus(v) - LOG2


# ---------------------------------------------------------------------------
# Kernel 1: fused joint-embedding + segment mean-pool (partial sums)
#   grid = (split, steps); "parallel" split feeds v7x's 2 TCs, "arbitrary"
#   steps is the node-tile reduction. Each split accumulates into its own
#   (G, d_out) output block (resident across steps).
# ---------------------------------------------------------------------------
def _fused_embed_pool_kernel(ids_ref, xj_ref, wj_ref, bj_ref, acc_ref):
    t = pl.program_id(1)

    @pl.when(t == 0)
    def _():
        acc_ref[...] = jnp.zeros_like(acc_ref)

    # joint embedding: [tile, d_in] @ [d_in, d_out] -> [pos | h] in f32
    h = (jnp.dot(xj_ref[...], wj_ref[...], preferred_element_type=jnp.float32)
         + bj_ref[...])                                            # (tile, d_out)

    num_graphs = acc_ref.shape[0]
    tile = xj_ref.shape[0]
    ids = ids_ref[...]                                             # (1, tile) i32
    seg = (jax.lax.broadcasted_iota(jnp.int32, (num_graphs, tile), 0) == ids
           ).astype(xj_ref.dtype)                                  # (G, tile) exact 0/1

    # segment sum via MXU; bf16 operands, f32 accumulation
    acc_ref[...] += jnp.dot(seg, h.astype(xj_ref.dtype),
                            preferred_element_type=jnp.float32)


def fused_embed_pool_pallas(batch_ids_2d, xj, wj, bj, num_graphs,
                            tile, nsplit, steps):
    n_pad, d_in = xj.shape
    d_out = wj.shape[1]
    assert n_pad == nsplit * steps * tile

    full = lambda s, t: (0, 0)
    flops = 2 * n_pad * d_in * d_out + 2 * n_pad * num_graphs * d_out
    bytes_accessed = int(xj.size * xj.dtype.itemsize
                         + batch_ids_2d.size * 4
                         + wj.size * wj.dtype.itemsize + bj.size * 4
                         + nsplit * num_graphs * d_out * 4)

    return pl.pallas_call(
        _fused_embed_pool_kernel,
        out_shape=jax.ShapeDtypeStruct((nsplit, num_graphs, d_out), jnp.float32),
        grid_spec=pltpu.PrefetchScalarGridSpec(
            num_scalar_prefetch=0,
            grid=(nsplit, steps),
            in_specs=[
                pl.BlockSpec((1, tile), lambda s, t: (0, s * steps + t)),
                pl.BlockSpec((tile, d_in), lambda s, t: (s * steps + t, 0)),
                pl.BlockSpec((d_in, d_out), full),
                pl.BlockSpec((1, d_out), full),
            ],
            out_specs=pl.BlockSpec((None, num_graphs, d_out),
                                   lambda s, t: (s, 0, 0))),
        compiler_params=pltpu.CompilerParams(
            dimension_semantics=("parallel", "arbitrary")),
        cost_estimate=pl.CostEstimate(flops=flops, transcendentals=0,
                                      bytes_accessed=bytes_accessed),
    )(batch_ids_2d, xj, wj, bj)


# ---------------------------------------------------------------------------
# Kernel 2: tiny trailing kernel: combine partial sums -> mean -> head MLP
#   everything f32; lane-dense (G, OUT_PAD) output, sliced to 3 outside.
# ---------------------------------------------------------------------------
def _head_kernel(part_ref, inv_ref, w1_ref, b1_ref, w2_ref, b2_ref,
                 w3_ref, b3_ref, o_ref):
    pooled = jnp.sum(part_ref[...], axis=0) * inv_ref[...]        # (G, d_out)
    h1 = _ssp(jnp.dot(pooled, w1_ref[...], preferred_element_type=jnp.float32)
              + b1_ref[...])
    h2 = _ssp(jnp.dot(h1, w2_ref[...], preferred_element_type=jnp.float32)
              + b2_ref[...])
    o_ref[...] = (jnp.dot(h2, w3_ref[...], preferred_element_type=jnp.float32)
                  + b3_ref[...]).astype(o_ref.dtype)


def head_pallas(partial, inv_counts, packed):
    nsplit, g, d_out = partial.shape
    f = packed["b1"].shape[1]
    hidden = packed["w2t"].shape[1]
    out_pad = packed["w3t"].shape[1]
    m3 = lambda i: (0, 0, 0)
    m2 = lambda i: (0, 0)
    return pl.pallas_call(
        _head_kernel,
        out_shape=jax.ShapeDtypeStruct((g, out_pad), jnp.float32),
        grid_spec=pltpu.PrefetchScalarGridSpec(
            num_scalar_prefetch=0,
            grid=(1,),
            in_specs=[pl.BlockSpec((nsplit, g, d_out), m3),
                      pl.BlockSpec((g, 1), m2),
                      pl.BlockSpec((d_out, f), m2),
                      pl.BlockSpec((1, f), m2),
                      pl.BlockSpec((f, hidden), m2),
                      pl.BlockSpec((1, hidden), m2),
                      pl.BlockSpec((hidden, out_pad), m2),
                      pl.BlockSpec((1, out_pad), m2)],
            out_specs=pl.BlockSpec((g, out_pad), m2)),
        compiler_params=pltpu.CompilerParams(dimension_semantics=("arbitrary",)),
    )(partial, inv_counts, packed["w1t"], packed["b1"], packed["w2t"],
      packed["b2"], packed["w3t"], packed["b3"])


# ---------------------------------------------------------------------------
# Parameter init (mimics torch nn.Linear defaults) + one-time packing
# ---------------------------------------------------------------------------
def _torch_linear_init(key, out_dim, in_dim):
    k_w, k_b = jax.random.split(key)
    bound = 1.0 / np.sqrt(in_dim)
    w = jax.random.uniform(k_w, (out_dim, in_dim), jnp.float32, -bound, bound)
    b = jax.random.uniform(k_b, (out_dim,), jnp.float32, -bound, bound)
    return w, b


def init_classifier_params(key, config, protein_atom_feature_dim,
                           ligand_atom_feature_dim):
    hidden_dim = config["hidden_dim"]
    num_ffn_head = config["num_ffn_head"]
    emb_dim = hidden_dim - 1 if config["node_indicator"] else hidden_dim
    pre_head_dim = hidden_dim if config["ignore_pos"] else hidden_dim + 3

    keys = jax.random.split(key, 5)
    wp, bp = _torch_linear_init(keys[0], emb_dim, protein_atom_feature_dim)
    wl, bl = _torch_linear_init(keys[1], emb_dim, ligand_atom_feature_dim)
    w1, b1 = _torch_linear_init(keys[2], num_ffn_head, pre_head_dim)
    w2, b2 = _torch_linear_init(keys[3], hidden_dim, num_ffn_head)
    w3, b3 = _torch_linear_init(keys[4], 3, hidden_dim)
    return {"protein_emb_w": wp, "protein_emb_b": bp,
            "ligand_emb_w": wl, "ligand_emb_b": bl,
            "head_w1": w1, "head_b1": b1,
            "head_w2": w2, "head_b2": b2,
            "head_w3": w3, "head_b3": b3}


def pack_params(params, config, compute_dtype=jnp.bfloat16):
    """One-time prep (hoisted out of the forward).

    Folds BOTH atom embeddings, the node_indicator column and (optionally) the
    pos pass-through into a single joint weight matrix:
        joint input  columns: [protein_feats | ligand_feats | is_ligand | pos]
        joint output columns: [pos | emb | indicator]  ( == [pos | h] )
    so the fused kernel runs one matmul per node tile regardless of atom type.
    Joint weight is cast to compute_dtype (bf16 by default: halves DMA bytes);
    biases and head weights stay f32.
    """
    node_ind = bool(config["node_indicator"])
    ignore_pos = bool(config["ignore_pos"])
    hidden = int(config["hidden_dim"])
    emb_dim = hidden - 1 if node_ind else hidden

    wp = jnp.asarray(params["protein_emb_w"], jnp.float32)        # [emb, d_p]
    bp = jnp.asarray(params["protein_emb_b"], jnp.float32)
    wl = jnp.asarray(params["ligand_emb_w"], jnp.float32)         # [emb, d_l]
    bl = jnp.asarray(params["ligand_emb_b"], jnp.float32)
    d_p, d_l = wp.shape[1], wl.shape[1]

    pos_w = 0 if ignore_pos else 3
    d_out = pos_w + hidden
    d_in = d_p + d_l + 1 + pos_w

    wj = jnp.zeros((d_in, d_out), jnp.float32)
    wj = wj.at[0:d_p, pos_w:pos_w + emb_dim].set(wp.T)
    wj = wj.at[d_p:d_p + d_l, pos_w:pos_w + emb_dim].set(wl.T)
    wj = wj.at[d_p + d_l, pos_w:pos_w + emb_dim].set(bl - bp)     # ligand bias delta
    if node_ind:
        wj = wj.at[d_p + d_l, pos_w + emb_dim].set(1.0)           # indicator column
    if not ignore_pos:                                            # pos pass-through
        wj = wj.at[d_p + d_l + 1 + jnp.arange(3), jnp.arange(3)].set(1.0)
    bj = jnp.zeros((1, d_out), jnp.float32).at[0, pos_w:pos_w + emb_dim].set(bp)

    w1t = jnp.asarray(params["head_w1"], jnp.float32).T           # [d_out, F]
    b1 = jnp.asarray(params["head_b1"], jnp.float32).reshape(1, -1)
    w2t = jnp.asarray(params["head_w2"], jnp.float32).T
    b2 = jnp.asarray(params["head_b2"], jnp.float32).reshape(1, -1)
    w3t = jnp.asarray(params["head_w3"], jnp.float32).T           # [hidden, 3]
    b3 = jnp.asarray(params["head_b3"], jnp.float32).reshape(1, -1)
    w3t_p = jnp.zeros((w3t.shape[0], OUT_PAD), jnp.float32).at[:, :3].set(w3t)
    b3_p = jnp.zeros((1, OUT_PAD), jnp.float32).at[:, :3].set(b3)

    return {"wj": wj.astype(compute_dtype), "bj": bj,
            "w1t": w1t, "b1": b1, "w2t": w2t, "b2": b2,
            "w3t": w3t_p, "b3": b3_p}


# ---------------------------------------------------------------------------
# Forward
# ---------------------------------------------------------------------------
def _pad_rows(a, n_target, fill=0):
    extra = n_target - a.shape[0]
    if extra <= 0:
        return a
    pad = jnp.full((extra,) + a.shape[1:], fill, a.dtype)
    return jnp.concatenate([a, pad], axis=0)


def classifier_multi_forward(packed, config, protein_pos, protein_v,
                             batch_protein, ligand_pos, ligand_v, batch_ligand,
                             num_graphs, tile=None):
    ignore_pos = bool(config["ignore_pos"])
    n_p, d_p = protein_v.shape
    n_l, d_l = ligand_v.shape
    n_all = n_p + n_l
    compute_dtype = packed["wj"].dtype

    # joint per-node feature stream [prot | lig | is_ligand | pos]
    prot_cols = [jnp.asarray(protein_v, jnp.float32),
                 jnp.zeros((n_p, d_l), jnp.float32),
                 jnp.zeros((n_p, 1), jnp.float32)]
    lig_cols = [jnp.zeros((n_l, d_p), jnp.float32),
                jnp.asarray(ligand_v, jnp.float32),
                jnp.ones((n_l, 1), jnp.float32)]
    if not ignore_pos:
        prot_cols.append(jnp.asarray(protein_pos, jnp.float32))
        lig_cols.append(jnp.asarray(ligand_pos, jnp.float32))
    xj = jnp.concatenate([jnp.concatenate(prot_cols, axis=1),
                          jnp.concatenate(lig_cols, axis=1)],
                         axis=0).astype(compute_dtype)

    # node-axis tiling: big tiles amortize per-step overhead; VMEM is nowhere
    # near the limit on any generation (per-step footprint is tens of KiB).
    if tile is None:
        tile = max(128, min(MAX_TILE, _round_up(_cdiv(n_all, 2), 128)))
    n_tiles = _cdiv(n_all, tile)
    nsplit = 2 if n_tiles >= 2 else 1          # v7x: one "parallel" slice per TC
    steps = _cdiv(n_tiles, nsplit)
    n_pad = nsplit * steps * tile

    xj = _pad_rows(xj, n_pad)
    # padded rows get batch id == num_graphs -> excluded from the segment mask
    batch_all = jnp.concatenate(
        [jnp.asarray(batch_protein, jnp.int32),
         jnp.asarray(batch_ligand, jnp.int32),
         jnp.full((n_pad - n_all,), num_graphs, jnp.int32)], axis=0).reshape(1, -1)

    counts = (jnp.zeros((num_graphs,), jnp.float32)
              .at[jnp.asarray(batch_protein, jnp.int32)].add(1.0)
              .at[jnp.asarray(batch_ligand, jnp.int32)].add(1.0))
    # NOTE: empty graphs pool to zeros (PyG global_mean_pool would give NaN).
    inv_counts = (1.0 / jnp.maximum(counts, 1.0)).reshape(num_graphs, 1)

    # TODO(synk): refine_net (EGNN / uni_o2 / EGTF) backbone not provided; identity.
    partial = fused_embed_pool_pallas(batch_all, xj, packed["wj"], packed["bj"],
                                      num_graphs, tile, nsplit, steps)
    pred_padded = head_pallas(partial, inv_counts, packed)
    return pred_padded[:, :3]


# ---------------------------------------------------------------------------
# Pure-JAX f32 reference (mirrors the PyTorch forward with refine_net=identity)
# ---------------------------------------------------------------------------
def reference_forward(params, config, protein_pos, protein_v, batch_protein,
                      ligand_pos, ligand_v, batch_ligand, num_graphs):
    hp = protein_v @ params["protein_emb_w"].T + params["protein_emb_b"]
    hl = ligand_v @ params["ligand_emb_w"].T + params["ligand_emb_b"]
    if config["node_indicator"]:
        hp = jnp.concatenate([hp, jnp.zeros((hp.shape[0], 1), hp.dtype)], axis=1)
        hl = jnp.concatenate([hl, jnp.ones((hl.shape[0], 1), hl.dtype)], axis=1)
    h_all = jnp.concatenate([hp, hl], axis=0)
    pos_all = jnp.concatenate([protein_pos, ligand_pos], axis=0)
    batch_all = jnp.concatenate([batch_protein, batch_ligand], axis=0)
    comb = h_all if config["ignore_pos"] else jnp.concatenate([pos_all, h_all], 1)
    sums = jax.ops.segment_sum(comb, batch_all, num_segments=num_graphs)
    counts = jax.ops.segment_sum(jnp.ones((comb.shape[0],), jnp.float32),
                                 batch_all, num_segments=num_graphs)
    pooled = sums / jnp.maximum(counts, 1.0)[:, None]
    h1 = _ssp(pooled @ params["head_w1"].T + params["head_b1"])
    h2 = _ssp(h1 @ params["head_w2"].T + params["head_b2"])
    return h2 @ params["head_w3"].T + params["head_b3"]


# ---------------------------------------------------------------------------
if __name__ == "__main__":
    config = {
        "hidden_dim": 32,
        "num_ffn_head": 32,
        "node_indicator": True,
        "ignore_pos": False,
        "pool": "mean",
        "model_type": "egnn",
    }
    protein_atom_feature_dim = 16
    ligand_atom_feature_dim = 8

    num_graphs = 2
    n_protein = 300   # 150 protein atoms per graph
    n_ligand = 84     # 42 ligand atoms per graph

    key = jax.random.PRNGKey(0)
    k_params, k_pp, k_pv, k_lp, k_lv = jax.random.split(key, 5)

    params = init_classifier_params(k_params, config,
                                    protein_atom_feature_dim,
                                    ligand_atom_feature_dim)
    packed = pack_params(params, config, compute_dtype=jnp.bfloat16)

    protein_pos = jax.random.normal(k_pp, (n_protein, 3), jnp.float32)
    protein_v = jax.random.normal(k_pv, (n_protein, protein_atom_feature_dim),
                                  jnp.float32)
    ligand_pos = jax.random.normal(k_lp, (n_ligand, 3), jnp.float32)
    ligand_classes = jax.random.randint(k_lv, (n_ligand,), 0,
                                        ligand_atom_feature_dim)
    ligand_v = jax.nn.one_hot(ligand_classes, ligand_atom_feature_dim,
                              dtype=jnp.float32)

    batch_protein = jnp.repeat(jnp.arange(num_graphs, dtype=jnp.int32),
                               n_protein // num_graphs)
    batch_ligand = jnp.repeat(jnp.arange(num_graphs, dtype=jnp.int32),
                              n_ligand // num_graphs)

    # tile=128 exercises the (parallel split) x (multi-step reduction) grid at
    # small N; production sizes use the auto tile (up to 4096).
    pred = classifier_multi_forward(packed, config, protein_pos, protein_v,
                                    batch_protein, ligand_pos, ligand_v,
                                    batch_ligand, num_graphs, tile=128)
    pred = jax.block_until_ready(pred)

    assert pred.shape == (num_graphs, 3), pred.shape
    assert bool(jnp.all(jnp.isfinite(pred)))

    ref = reference_forward(params, config, protein_pos, protein_v,
                            batch_protein, ligand_pos, ligand_v, batch_ligand,
                            num_graphs)
    max_err = float(jnp.max(jnp.abs(pred - ref)))
    assert max_err < 1e-1, f"max abs error vs f32 reference: {max_err}"
    print("KERNEL_OK")
</pallas_src>

<mosaic_0001>
module attributes {stable_mosaic.version = 11 : i64} {
  func.func @_fused_embed_pool_kernel(%arg0: i32, %arg1: i32, %arg2: memref<1x128xi32, #tpu.memory_space<vmem>>, %arg3: memref<128x28xbf16, #tpu.memory_space<vmem>>, %arg4: memref<28x35xbf16, #tpu.memory_space<vmem>>, %arg5: memref<1x35xf32, #tpu.memory_space<vmem>>, %arg6: memref<1x2x35xf32, #tpu.memory_space<vmem>>) attributes {dimension_semantics = [#tpu.dimension_semantics<parallel>, #tpu.dimension_semantics<arbitrary>], iteration_bounds = array<i64: 2, 2>, scalar_prefetch = 0 : i64, scratch_operands = 0 : i64, tpu.core_type = #tpu.core_type<tc>, window_params = [{transform_indices = @transform_0, window_bounds = array<i64: 1, 128>}, {transform_indices = @transform_1, window_bounds = array<i64: 128, 28>}, {pipeline_mode = #tpu.pipeline_mode<synchronous>, transform_indices = @transform_2, window_bounds = array<i64: 28, 35>}, {pipeline_mode = #tpu.pipeline_mode<synchronous>, transform_indices = @transform_3, window_bounds = array<i64: 1, 35>}, {transform_indices = @transform_4, window_bounds = array<i64: 1, 2, 35>}]} {
    %c0_i32 = arith.constant 0 : i32
    %0 = arith.cmpi eq, %arg1, %c0_i32 : i32
    %1 = arith.extui %0 : i1 to i32
    %c0_i32_0 = arith.constant 0 : i32
    %2 = arith.cmpi ne, %1, %c0_i32_0 : i32
    scf.if %2 {
      %cst_15 = arith.constant 0.000000e+00 : f32
      %24 = vector.broadcast %cst_15 : f32 to vector<2x35xf32>
      %c0_16 = arith.constant 0 : index
      %c0_17 = arith.constant 0 : index
      %c0_18 = arith.constant 0 : index
      %25 = vector.load %arg6[%c0_16, %c0_17, %c0_18] : memref<1x2x35xf32, #tpu.memory_space<vmem>>, vector<1x2x35xf32>
      %26 = vector.shape_cast %25 : vector<1x2x35xf32> to vector<2x35xf32>
      %27 = vector.shape_cast %24 : vector<2x35xf32> to vector<1x2x35xf32>
      tpu.vector_store %arg6[%c0_16, %c0_17, %c0_18], %27 {strides = array<i32>} : memref<1x2x35xf32, #tpu.memory_space<vmem>>, vector<1x2x35xf32>,
    } else {
    }
    %c0 = arith.constant 0 : index
    %c0_1 = arith.constant 0 : index
    %3 = vector.load %arg3[%c0, %c0_1] : memref<128x28xbf16, #tpu.memory_space<vmem>>, vector<128x28xbf16>
    %c0_2 = arith.constant 0 : index
    %c0_3 = arith.constant 0 : index
    %4 = vector.load %arg4[%c0_2, %c0_3] : memref<28x35xbf16, #tpu.memory_space<vmem>>, vector<28x35xbf16>
    %cst = arith.constant dense<0.000000e+00> : vector<128x35xf32>
    %5 = tpu.matmul %3, %4, %cst {dimension_numbers = #tpu.dot_dimension_numbers<[1], [0], [0], [1], [0, 0, 1, 1], [], []>} : vector<128x28xbf16>, vector<28x35xbf16>, vector<128x35xf32> -> vector<128x35xf32>
    %c0_4 = arith.constant 0 : index
    %c0_5 = arith.constant 0 : index
    %6 = vector.load %arg5[%c0_4, %c0_5] : memref<1x35xf32, #tpu.memory_space<vmem>>, vector<1x35xf32>
    %7 = vector.broadcast %6 : vector<1x35xf32> to vector<128x35xf32>
    %8 = arith.addf %5, %7 : vector<128x35xf32>
    %c0_6 = arith.constant 0 : index
    %c0_7 = arith.constant 0 : index
    %9 = vector.load %arg2[%c0_6, %c0_7] : memref<1x128xi32, #tpu.memory_space<vmem>>, vector<1x128xi32>
    %10 = tpu.iota {dimensions = array<i32: 0>} : vector<2x128xi32>
    %11 = vector.broadcast %9 : vector<1x128xi32> to vector<2x128xi32>
    %12 = arith.cmpi eq, %10, %11 : vector<2x128xi32>
    %13 = arith.extui %12 : vector<2x128xi1> to vector<2x128xi32>
    %14 = arith.sitofp %13 : vector<2x128xi32> to vector<2x128xf32>
    %15 = arith.truncf %14 : vector<2x128xf32> to vector<2x128xbf16>
    %c0_8 = arith.constant 0 : index
    %c0_9 = arith.constant 0 : index
    %c0_10 = arith.constant 0 : index
    %16 = vector.load %arg6[%c0_8, %c0_9, %c0_10] : memref<1x2x35xf32, #tpu.memory_space<vmem>>, vector<1x2x35xf32>
    %17 = vector.shape_cast %16 : vector<1x2x35xf32> to vector<2x35xf32>
    %18 = arith.truncf %8 : vector<128x35xf32> to vector<128x35xbf16>
    %cst_11 = arith.constant dense<0.000000e+00> : vector<2x35xf32>
    %19 = tpu.matmul %15, %18, %cst_11 {dimension_numbers = #tpu.dot_dimension_numbers<[1], [0], [0], [1], [0, 0, 1, 1], [], []>} : vector<2x128xbf16>, vector<128x35xbf16>, vector<2x35xf32> -> vector<2x35xf32>
    %20 = arith.addf %17, %19 : vector<2x35xf32>
    %c0_12 = arith.constant 0 : index
    %c0_13 = arith.constant 0 : index
    %c0_14 = arith.constant 0 : index
    %21 = vector.load %arg6[%c0_12, %c0_13, %c0_14] : memref<1x2x35xf32, #tpu.memory_space<vmem>>, vector<1x2x35xf32>
    %22 = vector.shape_cast %21 : vector<1x2x35xf32> to vector<2x35xf32>
    %23 = vector.shape_cast %20 : vector<2x35xf32> to vector<1x2x35xf32>
    tpu.vector_store %arg6[%c0_12, %c0_13, %c0_14], %23 {strides = array<i32>} : memref<1x2x35xf32, #tpu.memory_space<vmem>>, vector<1x2x35xf32>,
    return
  }
  func.func @transform_0(%arg0: i32, %arg1: i32) -> (i32, i32) {
    %c2_i32 = arith.constant 2 : i32
    %0 = arith.muli %arg0, %c2_i32 : i32
    %1 = arith.addi %0, %arg1 : i32
    %c0_i32 = arith.constant 0 : i32
    %c0_i32_0 = arith.constant 0 : i32
    return %c0_i32, %1 : i32, i32
  }
  func.func @transform_1(%arg0: i32, %arg1: i32) -> (i32, i32) {
    %c2_i32 = arith.constant 2 : i32
    %0 = arith.muli %arg0, %c2_i32 : i32
    %1 = arith.addi %0, %arg1 : i32
    %c0_i32 = arith.constant 0 : i32
    %c0_i32_0 = arith.constant 0 : i32
    return %1, %c0_i32 : i32, i32
  }
  func.func @transform_2(%arg0: i32, %arg1: i32) -> (i32, i32) {
    %c0_i32 = arith.constant 0 : i32
    %c0_i32_0 = arith.constant 0 : i32
    %c0_i32_1 = arith.constant 0 : i32
    return %c0_i32, %c0_i32_0 : i32, i32
  }
  func.func @transform_3(%arg0: i32, %arg1: i32) -> (i32, i32) {
    %c0_i32 = arith.constant 0 : i32
    %c0_i32_0 = arith.constant 0 : i32
    %c0_i32_1 = arith.constant 0 : i32
    return %c0_i32, %c0_i32_0 : i32, i32
  }
  func.func @transform_4(%arg0: i32, %arg1: i32) -> (i32, i32, i32) {
    %c0_i32 = arith.constant 0 : i32
    %c0_i32_0 = arith.constant 0 : i32
    %c0_i32_1 = arith.constant 0 : i32
    return %arg0, %c0_i32, %c0_i32_0 : i32, i32, i32
  }
}

</mosaic_0001>

<bundles_post_ra>
// kernel: tpu_custom_call.1
= control target key start
LH: loop header
LB: loop body
LE: loop exit
PB: predicated region body
PF: predicated region fallthrough
CT: control target
= control target key end

     0   :  { %9 = vsyncpa [#allocation3], 0  ;;  %s1113_s0 = inlined_call_operand.vmem [shape: s32[1,512], index: 0, kind: input, shape index: {}]   ;;  %s1114_s1 = inlined_call_operand.vmem [shape: bf16[512,28], index: 1, kind: input, shape index: {}]   ;;  %s1115_s2 = inlined_call_operand.vmem [shape: bf16[28,35], index: 2, kind: input, shape index: {}]   ;;  %s1116_s3 = inlined_call_operand.vmem [shape: f32[1,35], index: 3, kind: input, shape index: {}]   ;;  %s1117_s4 = inlined_call_operand.hbm [shape: f32[2,2,35], index: 4, kind: output, shape index: {}]  }
   0x1   :  { %11 = vsyncpa [#allocation3 + $0x1], 0  ;;  %s932_s15 = smov 0   ;;  %s934_s16 = smov 0  }
   0x2   :  { %s936_s17 = smov 0   ;;  %s938_s18 = smov 0  }
   0x3   :  { %s940_s19 = smov 0   ;;  %s942_s20 = smov 0  }
   0x4   :  { %s944_s21 = smov 0   ;;  %s946_s22 = smov 0  }
   0x5 LB: > { %s619_s23 = sadd.s32 4294967295, %s900_s22   ;;  %s620_s24 = sadd.s32 4294967294, %s900_s22   ;;  %s900_s22 = sphi %s946_s22, %s17_s22   ;;  %s896_s21 = sphi %s944_s21, %s1126_s21   ;;  %s892_s20 = sphi %s942_s20, %s1125_s20   ;;  %s888_s19 = sphi %s940_s19, %s1124_s19   ;;  %s884_s18 = sphi %s938_s18, %s1123_s18   ;;  %s880_s17 = sphi %s936_s17, %s1122_s17   ;;  %s876_s16 = sphi %s934_s16, %s1121_s16   ;;  %s872_s15 = sphi %s932_s15, %s1120_s15  }
   0x6   : > { %s26_s25 = sadd.s32 1, %s892_s20  ;;  %s29_s26 = sadd.s32 1, %s896_s21 }
   0x7   : > { %p27_p0 = scmp.ge.s32.totalorder %s26_s25, 2  ;;  %p148_p1 = scmp.ne.s32.totalorder %s880_s17, %s876_s16 }
   0x8   : > { %p149_p2 = scmp.eq.s32.totalorder %s619_s23, 3  ;;  %p154_p4 = scmp.ne.s32.totalorder %s876_s16, %s872_s15 }
   0x9   : > { %s1128_s25 = smov (%p27_p0, %s26_s25), 0  ;;  %s1130_s26 = smov (!%p27_p0, %s29_s26), %s896_s21 }
   0xa   : > { %p981_p3 = por %p149_p2, %p148_p1  ;;  %p31_p5 = scmp.ge.s32.totalorder %s1130_s26, 2 }
   0xb   : > { %p155_p6 = scmp.eq.s32.totalorder %s620_s24, 3  ;;  %p627_p7 = scmp.ge.s32.totalorder %s900_s22, 1 }
   0xc   : > { %p202_p8 = scmp.lt.s32.totalorder %s900_s22, 5  ;;  %s1132_s26 = smov (%p31_p5, %s1130_s26), 0 }
   0xd   : > { %p991_p9 = por %p155_p6, %p154_p4  ;;  %s135_s29 = ssub.s32 %s896_s21, %s1132_s26 }
   0xe   : > { %p203_p10 = pnand %p627_p7, %p202_p8  ;;  %s138_s30 = sadd.s32 1, %s880_s17 }
   0xf   : > { %p136_p11 = scmp.eq.s32.totalorder %s135_s29, 0  ;;  %s232_s6 = sand.u32 (!%p203_p10), 1, %s876_s16  }
  0x10   : > { %206 = sbr.rel (%p203_p10) target bundleno = 519 (0x207), region = 36  ;;  %s629_s7 = sshll.u32 (!%p203_p10), %s888_s19, 1 }
  0x11   : > { %s999_s5 = scalar_select %p136_p11, %s880_s17, %s138_s30  }
  0x12   : > { %s628_s8 = sshll.u32 (!%p203_p10), %s232_s6, 1  ;;  %s236_s9 = sadd.s32 (!%p203_p10), %s884_s18, %s629_s7 }
  0x13   : > { %p237_p12 = scmp.lt.s32.totalorder (!%p203_p10), %s236_s9, 3  ;;  %s631_s10 = sshll.u32 (!%p203_p10), %s236_s9, 4 }
  0x14   : > { %p245_p13 = scmp.lt.s32.totalorder (!%p203_p10), %s631_s10, 63  ;;  %s1017_s30 = scalar_lea.vmem (!%p203_p10), [#allocation2], %s628_s8 }
  0x15   : > { %p633_p0 = scmp.ne.s32.totalorder (!%p203_p10), %s884_s18, 0 }
  0x17   : > { %s1134_s9 = smov (!%p237_p12, %s236_s9), 3  ;;  %s1136_s10 = smov (!%p245_p13, %s631_s10), 63 }
  0x18   : > { %s239_s13 = scalar_lea.vmem %s1113_s0, %s1134_s9  ;;  %s632_s14 = sshll.u32 %s1136_s10, 2  ;;  %vm257_vm0 = vcmask (!%p633_p0), 279552   ;;  %v902_v0 = vmov (!%p633_p0), 0.0  }
  0x19   : > { %s1015_s29 = scalar_lea.vmem %s1114_s1, %s632_s14  ;;  %256 = sbr.rel (%p633_p0) target bundleno = 32 (0x20), region = 40  ;;  %258 = vst.msk [vmem:[%s1017_s30] sm:$0x3] (!%p633_p0), %vm257_vm0, %v902_v0 }
  0x20 PF: > { %v796_v1 = vld [vmem:[%s1115_s2] sm:$0xff]   ;;  %vm362_vm1 = vcmask 1045504   ;;  %v797_v2 = vld [vmem:[%s1115_s2 + $0x8] sm:$0x3f]   ;;  %vm337_vm2 = vcmask 228352   ;;  %v800_v6 = vld [vmem:[%s1015_s29 + $0x10] sm:$0xff]   ;;  %v464_v46 = vlaneseq }
  0x21   : > { %680 = vmatprep.subr.bf16.mxu0 %v796_v1  ;;  %v798_v3 = vld [vmem:[%s1015_s29] sm:$0xff]   ;;  %v364_v4 = vsel %vm362_vm1, %v797_v2, 0  ;;  %v799_v5 = vld [vmem:[%s1015_s29 + $0x8] sm:$0xff]   ;;  %v801_v7 = vld [vmem:[%s1015_s29 + $0x18] sm:$0xff]   ;;  %v903_v12 = vmov 0.0   ;;  %vm904_vm3 = vmmov 0  }
  0x22   : > { %681 = vmatpush3.bf16.msra.mxu0 %v796_v1  ;;  %684 = vmatprep.mubr.msk.bf16.mxu0 %vm337_vm2, %v798_v3  ;;  %v802_v8 = vld [vmem:[%s1015_s29 + $0x20] sm:$0xff]   ;;  %v803_v9 = vld [vmem:[%s1015_s29 + $0x28] sm:$0xff]   ;;  %v804_v10 = vld [vmem:[%s1015_s29 + $0x30] sm:$0xff]   ;;  %v465_v54 = vshrl.u32 %v464_v46, 7  ;;  %v905_v57 = vmov 1.0|1.0  }
  0x23   : > { %720 = vmatprep.subr.msk.bf16.mxu0 %vm362_vm1, %v797_v2  ;;  %v805_v11 = vld [vmem:[%s1015_s29 + $0x38] sm:$0xff]   ;;  %700 = vmatprep.subr.bf16.mxu1 %v903_v12  ;;  %v634_v14 = vld [vmem:[%s1116_s3] ss:$0 sm:$0xff]  ;;  %s658_s24 = sshll.u32 %s888_s19, 5  ;;  %s540_s29 = sshll.u32 %s1017_s30, 4  ;;  %vm524_vm6 = vcmask 279552   ;;  %s1059_s29 = int_to_ptr.vmem [resolvable:$true] %s540_s29 }
  0x24   : > { %716 = vmatprep.mubr.msk.bf16.mxu1 %vm904_vm3, %v903_v12  ;;  %v653_v56 = vld [vmem:[%s239_s13] ss:$0 sm:$0xff]  ;;  %s1057_s13 = scalar_lea.hbm %s1117_s4, %s658_s24  ;;  %s527_s19 = scalar_lea.sflag [#allocation3], %s232_s6 }
  0x25   : > { %vm470_vm4 = vcmp.eq.s32.totalorder %v465_v54, %v653_v56  ;;  %v474_v58 = vld [vmem:[%s1017_s30] sm:$0x3]  ;;  %s806_s11 = scalar_lea.vmem %s1059_s29, 32  ;;  %s906_s8 = smov [#allocation2]  }
  0x26   : > { %683 = vmatpush3.bf16.msra.mxu0 %v364_v4  ;;  %vm655_vm5 = vmpackc.low %vm470_vm4, %vm470_vm4  ;;  %p807_p1 = scmp.ne.s32.totalorder %s1059_s29, %s806_s11  ;;  %s810_s10 = sshll.u32 %s906_s8, 4  ;;  %s811_s10 = int_to_ptr.vmem [resolvable:$false] %s810_s10 }
  0x27   : > { %s812_s18 = scalar_lea.vmem %s811_s10, 64  ;;  %p813_p5 = scmp.lt.s32.totalorder %s1059_s29, %s811_s10 }
  0x28   : > { %p808_p2 = pnand %p807_p1, %p981_p3  ;;  %p814_p6 = scmp.lt.s32.totalorder %s812_s18, %s806_s11 }
  0x29   : > { %685 = vmatmul.mubr.msk.bf16.vlgmr.msra.gmra.mrb[0].mxu0 %vm337_vm2, %v799_v5 }
  0x2a   : > { %688 = vmatprep.mubr.msk.bf16.mxu0 %vm337_vm2, %v800_v6  ;;  %p809_p4 = pneg %p808_p2  ;;  %p815_p7 = por %p814_p6, %p813_p5 }
  0x2c   : > { %p816_p8 = pnand %p815_p7, %p809_p4 }
  0x31   : > { %689 = vmatmul.mubr.msk.bf16.gmra.mrb[4].mxu0 %vm337_vm2, %v801_v7 }
  0x32   : > { %692 = vmatprep.mubr.msk.bf16.mxu0 %vm337_vm2, %v802_v8 }
  0x39   : > { %693 = vmatmul.mubr.msk.bf16.gmra.mrb[8].mxu0 %vm337_vm2, %v803_v9 }
  0x3a   : > { %696 = vmatprep.mubr.msk.bf16.mxu0 %vm337_vm2, %v804_v10 }
  0x41   : > { %697 = vmatmul.mubr.msk.bf16.gmra.mrb[12].mxu0 %vm337_vm2, %v805_v11 }
  0xfc   : > { %v686_v13 = vpop.f32.mrb[0].mxu0 }
  0xfd   : > { %v400_v15 = vpop.f32.mrb[1].mxu0  ;;  %v409_v17 = vadd.f32 %v686_v13, %v634_v14 }
  0xfe   : > { %v687_v16 = vpop.f32.mrb[2].mxu0  ;;  %v401_v20 = vadd.f32 %v634_v14, %v400_v15 }
  0xff   : > { %v412_v18 = vadd.f32 %v687_v16, %v634_v14  ;;  %v403_v19 = vpop.f32.mrb[3].mxu0 }
 0x100   : > { %v404_v21 = vadd.f32 %v634_v14, %v403_v19 }
 0x101   : > { %v476_v22 = vpack.c.bf16 %v412_v18, %v409_v17 }
 0x102   : > { %v475_v23 = vpack.c.bf16 %v404_v21, %v401_v20 }
 0x104   : > { %v690_v24 = vpop.f32.mrb[4].mxu0  ;;  %701 = vmatpush3.bf16.msra.mxu1 %v475_v23 }
 0x105   : > { %v416_v25 = vpop.f32.mrb[5].mxu0  ;;  %702 = vmatprep.subr.bf16.mxu1 %v903_v12  ;;  %v425_v27 = vadd.f32 %v690_v24, %v634_v14 }
 0x106   : > { %v691_v26 = vpop.f32.mrb[6].mxu0  ;;  %v417_v30 = vadd.f32 %v634_v14, %v416_v25 }
 0x107   : > { %v428_v28 = vadd.f32 %v691_v26, %v634_v14  ;;  %v419_v29 = vpop.f32.mrb[7].mxu0 }
 0x108   : > { %v420_v31 = vadd.f32 %v634_v14, %v419_v29  ;;  %703 = vmatpush3.bf16.msra.mxu1 %v476_v22 }
 0x109   : > { %v478_v32 = vpack.c.bf16 %v428_v28, %v425_v27  ;;  %704 = vmatprep.subr.bf16.mxu1 %v903_v12 }
 0x10a   : > { %v477_v33 = vpack.c.bf16 %v420_v31, %v417_v30 }
 0x10c   : > { %v694_v34 = vpop.f32.mrb[8].mxu0  ;;  %705 = vmatpush3.bf16.msra.mxu1 %v477_v33 }
 0x10d   : > { %v432_v35 = vpop.f32.mrb[9].mxu0  ;;  %706 = vmatprep.subr.bf16.mxu1 %v903_v12  ;;  %v441_v37 = vadd.f32 %v694_v34, %v634_v14 }
 0x10e   : > { %v695_v36 = vpop.f32.mrb[10].mxu0  ;;  %v433_v40 = vadd.f32 %v634_v14, %v432_v35 }
 0x10f   : > { %v444_v38 = vadd.f32 %v695_v36, %v634_v14  ;;  %v435_v39 = vpop.f32.mrb[11].mxu0 }
 0x110   : > { %v436_v41 = vadd.f32 %v634_v14, %v435_v39  ;;  %707 = vmatpush3.bf16.msra.mxu1 %v478_v32 }
 0x111   : > { %v480_v42 = vpack.c.bf16 %v444_v38, %v441_v37  ;;  %708 = vmatprep.subr.bf16.mxu1 %v903_v12 }
 0x112   : > { %v479_v43 = vpack.c.bf16 %v436_v41, %v433_v40 }
 0x114   : > { %v698_v44 = vpop.f32.mrb[12].mxu0  ;;  %709 = vmatpush3.bf16.msra.mxu1 %v479_v43 }
 0x115   : > { %v448_v45 = vpop.f32.mrb[13].mxu0  ;;  %710 = vmatprep.subr.bf16.mxu1 %v903_v12  ;;  %v457_v48 = vadd.f32 %v698_v44, %v634_v14 }
 0x116   : > { %v699_v47 = vpop.f32.mrb[14].mxu0  ;;  %v449_v51 = vadd.f32 %v634_v14, %v448_v45 }
 0x117   : > { %v460_v49 = vadd.f32 %v699_v47, %v634_v14  ;;  %v451_v50 = vpop.f32.mrb[15].mxu0 }
 0x118   : > { %v452_v52 = vadd.f32 %v634_v14, %v451_v50  ;;  %711 = vmatpush3.bf16.msra.mxu1 %v480_v42 }
 0x119   : > { %v482_v53 = vpack.c.bf16 %v460_v49, %v457_v48  ;;  %712 = vmatprep.subr.bf16.mxu1 %v903_v12 }
 0x11a   : > { %v481_v55 = vpack.c.bf16 %v452_v52, %v449_v51 }
 0x11c   : > { %713 = vmatpush3.bf16.msra.mxu1 %v481_v55 }
 0x11d   : > { %714 = vmatprep.subr.bf16.mxu1 %v903_v12 }
 0x120   : > { %715 = vmatpush3.bf16.msra.mxu1 %v482_v53 }
 0x123   : > { %717 = vmatmul.mubr.msk.bf16.vlgmr.msra.gmra.mrb[0].mxu1 %vm655_vm5, %v905_v57 }
 0x1f6   : > { %v517_v59 = vpop.f32.mrb[0].mxu1 }
 0x1f7   : > { %v523_v60 = vadd.f32 %v517_v59, %v474_v58  ;;  %v718_v61 = vpop.f32.mrb[1].mxu1 }
 0x1f8   : > { %v520_v62 = vpop.f32.mrb[2].mxu1 }
 0x1f9   : > { %v719_v63 = vpop.f32.mrb[3].mxu1  ;;  %525 = vst.msk [vmem:[%s1017_s30] sm:$0x3] %vm524_vm6, %v523_v60 }
 0x1fa   : > { %819 = shalt.err (!%p816_p8)
}
 0x1fb   : > { %s820_s6 = scalar_lea.hbm %s1057_s13, 32  ;;  %s824_s14 = scalar_lea.hbm %s1117_s4, 64 }
 0x1fc   : > { %p821_p10 = scmp.ne.s32.totalorder %s1057_s13, %s820_s6  ;;  %p825_p13 = scmp.lt.u32.totalorder %s1057_s13, %s1117_s4 }
 0x1fd   : > { %p826_p0 = scmp.lt.u32.totalorder %s824_s14, %s820_s6  ;;  %p828_p2 = scmp.lt.u32.totalorder %s820_s6, %s1057_s13 }
 0x1fe   : > { %p822_p11 = pnand %p821_p10, %p981_p3 }
 0x1ff   : > { %p827_p1 = por %p826_p0, %p825_p13 }
 0x200   : > { %p823_p12 = pneg %p822_p11 }
 0x201   : > { %p829_p4 = por %p828_p2, %p827_p1 }
 0x203   : > { %p830_p5 = pnand %p829_p4, %p823_p12 }
 0x205   : > { %833 = shalt.err (!%p830_p5)
}
 0x206   : > { %721 = dma.vmem_to_hbm [thread:$0]  (%p981_p3), %s1059_s29, 32, %s1057_s13, %s527_s19  }
 0x207 PF: > { %p727_p6 = scmp.ge.s32.totalorder %s900_s22, 2  ;;  %s552_s7 = sand.u32 1, %s872_s15  }
 0x208   : > { %s553_s9 = scalar_lea.sflag [#allocation3], %s552_s7 }
 0x209   : > { %p724_p7 = pnand %p727_p6, %p991_p9 }
 0x20b   : > { %867 = dma.done.wait (!%p724_p7), %s553_s9, 32  }
 0x20c   : > { %869 = vsyncadd (!%p724_p7), %s553_s9, 4294967264  ;;  %s17_s22 = sadd.s32 1, %s900_s22   ;;  %s1120_s15 = smov %s876_s16 }
 0x20d   : > { %p14_p8 = scmp.ge.s32.totalorder %s17_s22, 6   ;;  %s1121_s16 = smov %s880_s17 }
 0x20e   : > { %s1122_s17 = smov %s999_s5  ;;  %s1123_s18 = smov %s892_s20 }
 0x20f   : > { %s1124_s19 = smov %s896_s21  ;;  %s1125_s20 = smov %s1128_s25 }
 0x210   : > { %s1126_s21 = smov %s1132_s26  ;;  %16 = sbr.rel (!%p14_p8) target bundleno = 5 (0x5), region = 78 }
 0x217   :  { %558 = vsyncpa [#allocation3], 1 }
 0x218   :  { %560 = vsyncpa [#allocation3 + $0x1], 1 }

</bundles_post_ra>
